<compile_context>
chip_gen: v7x
topology: tpu7x:2x2x1
jax: 0.10.0
libtpu: 0.0.40
codegen_flags: <defaults>
</compile_context>

<pallas_src>
import functools

import jax
import jax.numpy as jnp
from jax.experimental import pallas as pl
from jax.experimental.pallas import tpu as pltpu


# ----------------------------- Pallas kernels ------------------------------


def _embed_kernel(style_ref, w_ref, b_ref, out_ref):
    # style: (B, E), w: (E, 2C), b: (1, 2C)  ->  out: (B, 2C) = Linear(SiLU(style))
    s = style_ref[...].astype(jnp.float32)
    s = s * jax.nn.sigmoid(s)  # SiLU
    y = jnp.dot(s, w_ref[...].astype(jnp.float32),
                preferred_element_type=jnp.float32)
    out_ref[...] = (y + b_ref[...].astype(jnp.float32)).astype(out_ref.dtype)


def _gn_silu_pool_kernel(x_ref, gamma_ref, beta_ref, out_ref, *, num_groups, eps):
    # x: (1, 8, C, P) -- the 8 offsets of each 2x2x2 pooling cell of a (C, D, H, W) volume.
    # out: (1, C, P)  = AvgPool2x2x2( SiLU( GroupNorm(x) ) )
    x = x_ref[0].astype(jnp.float32)                      # (8, C, P)
    c = x.shape[1]
    cg = c // num_groups
    gamma = gamma_ref[...].astype(jnp.float32)            # (C, 1)
    beta = beta_ref[...].astype(jnp.float32)
    if cg == 1:
        # one channel per group -> fully vectorized per-channel stats
        mu = jnp.mean(jnp.mean(x, axis=0), axis=-1, keepdims=True)          # (C, 1)
        xc = x - mu[None]
        var = jnp.mean(jnp.mean(xc * xc, axis=0), axis=-1, keepdims=True)   # (C, 1)
        inv = jax.lax.rsqrt(var + eps)
        y = xc * (inv * gamma)[None] + beta[None]
        y = y * jax.nn.sigmoid(y)                         # SiLU
        out_ref[0] = jnp.mean(y, axis=0).astype(out_ref.dtype)
    else:
        for g in range(num_groups):
            lo, hi = g * cg, (g + 1) * cg
            sl = x[:, lo:hi, :]
            mu = jnp.mean(sl)
            sc = sl - mu
            var = jnp.mean(sc * sc)
            inv = jax.lax.rsqrt(var + eps)
            y = sc * inv * gamma[lo:hi][None] + beta[lo:hi][None]
            y = y * jax.nn.sigmoid(y)
            out_ref[0, lo:hi, :] = jnp.mean(y, axis=0).astype(out_ref.dtype)


def _conv_gn_film_silu_kernel(xt_ref, w_ref, b_ref, a_ref, fb_ref, out_ref,
                              *, num_groups, eps):
    # Fused: conv1 (im2col matmul) -> GroupNorm16 -> FiLM (1+scale, shift) -> SiLU
    # xt: (1, K, P), w: (C_out, K), b: (C_out, 1), a/fb: (1, C_out, 1)
    #   a  = gamma2 * (1 + scale)      fb = beta2 * (1 + scale) + shift
    y = jnp.dot(w_ref[...].astype(jnp.float32), xt_ref[0].astype(jnp.float32),
                preferred_element_type=jnp.float32)
    y = y + b_ref[...].astype(jnp.float32)                # (C_out, P), full spatial per batch
    c = y.shape[0]
    cg = c // num_groups
    a = a_ref[0].astype(jnp.float32)                      # (C_out, 1)
    fb = fb_ref[0].astype(jnp.float32)                    # (C_out, 1)
    if cg == 1:
        mu = jnp.mean(y, axis=-1, keepdims=True)
        yc = y - mu
        var = jnp.mean(yc * yc, axis=-1, keepdims=True)
        z = yc * (jax.lax.rsqrt(var + eps) * a) + fb
        z = z * jax.nn.sigmoid(z)                         # SiLU
        out_ref[0] = z.astype(out_ref.dtype)
    else:
        for g in range(num_groups):
            lo, hi = g * cg, (g + 1) * cg
            sl = y[lo:hi, :]
            mu = jnp.mean(sl)
            sc = sl - mu
            var = jnp.mean(sc * sc)
            z = sc * (jax.lax.rsqrt(var + eps) * a[lo:hi]) + fb[lo:hi]
            z = z * jax.nn.sigmoid(z)
            out_ref[0, lo:hi, :] = z.astype(out_ref.dtype)


def _conv_skip_kernel(xt_ref, w_ref, b_ref, skip_ref, out_ref):
    # conv2 + fused (2x2x2 average-pooled, narrow_as-cropped) residual skip
    y = jnp.dot(w_ref[...].astype(jnp.float32), xt_ref[0].astype(jnp.float32),
                preferred_element_type=jnp.float32)
    skip = jnp.mean(skip_ref[0].astype(jnp.float32), axis=0)   # (C_out, P)
    out_ref[0] = (y + b_ref[...].astype(jnp.float32) + skip).astype(out_ref.dtype)


# ------------------------------ wrapper glue --------------------------------


def _to_pool_cells(x5):
    """(B, C, D, H, W) -> (B, 8, C, D/2*H/2*W/2): the 8 offsets of each 2x2x2 cell."""
    B, C, D, H, W = x5.shape
    xc = x5.reshape(B, C, D // 2, 2, H // 2, 2, W // 2, 2)
    xc = jnp.transpose(xc, (0, 3, 5, 7, 1, 2, 4, 6))      # (B, 2,2,2, C, D/2, H/2, W/2)
    return xc.reshape(B, 8, C, (D // 2) * (H // 2) * (W // 2))


def _im2col3(x5):
    """3x3x3 valid im2col: (B, C, D, H, W) -> (B, 27*C, Do*Ho*Wo), channel index = tap*C + ci."""
    B, C, D, H, W = x5.shape
    Do, Ho, Wo = D - 2, H - 2, W - 2
    taps = []
    for kd in range(3):
        for kh in range(3):
            for kw in range(3):
                taps.append(x5[:, :, kd:kd + Do, kh:kh + Ho, kw:kw + Wo])
    xt = jnp.stack(taps, axis=1)                          # (B, 27, C, Do, Ho, Wo)
    return xt.reshape(B, 27 * C, Do * Ho * Wo), (Do, Ho, Wo)


def _conv_weight_mat(w):
    """(C_out, C_in, 3, 3, 3) torch layout -> (C_out, 27*C_in) matching _im2col3 ordering."""
    c_out, c_in = w.shape[0], w.shape[1]
    return jnp.transpose(w, (0, 2, 3, 4, 1)).reshape(c_out, 27 * c_in)


def residual_down_block_forward(x, style, params, *, num_groups=16, eps=1e-6):
    """Pallas forward of ResidualUpDownBlock(in==out channels, padding=0, down=True)."""
    B, C, D, H, W = x.shape
    assert D % 2 == 0 and H % 2 == 0 and W % 2 == 0, "down path needs even spatial dims"
    assert C % num_groups == 0
    c_out = C                      # Downsample(use_conv=False) forces in==out; skip = Identity
    two_c = 2 * c_out
    dtype = x.dtype
    par1 = pltpu.CompilerParams(dimension_semantics=("parallel",))

    # ---- 1. style embedding: SiLU -> Linear -------------------------------
    s = pl.pallas_call(
        _embed_kernel,
        out_shape=jax.ShapeDtypeStruct((B, two_c), jnp.float32),
    )(style,
      params["embed_w"].T.astype(dtype),                  # (E, 2C), pre-transposed
      params["embed_b"].reshape(1, two_c).astype(jnp.float32))

    # ---- 2. main path: GroupNorm -> SiLU -> AvgPool2 (fused) --------------
    Dp, Hp, Wp = D // 2, H // 2, W // 2
    Ph = Dp * Hp * Wp
    x_cells = _to_pool_cells(x)                           # (B, 8, C, Ph)
    gamma1 = params["gn1_gamma"].reshape(C, 1).astype(jnp.float32)
    beta1 = params["gn1_beta"].reshape(C, 1).astype(jnp.float32)
    pooled = pl.pallas_call(
        functools.partial(_gn_silu_pool_kernel, num_groups=num_groups, eps=eps),
        out_shape=jax.ShapeDtypeStruct((B, C, Ph), dtype),
        grid=(B,),
        in_specs=[
            pl.BlockSpec((1, 8, C, Ph), lambda b: (b, 0, 0, 0)),
            pl.BlockSpec((C, 1), lambda b: (0, 0)),
            pl.BlockSpec((C, 1), lambda b: (0, 0)),
        ],
        out_specs=pl.BlockSpec((1, C, Ph), lambda b: (b, 0, 0)),
        compiler_params=par1,
    )(x_cells, gamma1, beta1)
    pooled5 = pooled.reshape(B, C, Dp, Hp, Wp)

    # ---- 3+4. conv1 (im2col matmul) + GroupNorm2 + FiLM + SiLU (one kernel) ----
    xt1, (D1, H1, W1) = _im2col3(pooled5)                 # (B, 27C, P1)
    P1 = D1 * H1 * W1
    K1 = 27 * C
    w1 = _conv_weight_mat(params["conv1_w"]).astype(dtype)
    b1 = params["conv1_b"].reshape(c_out, 1).astype(jnp.float32)
    scale = s[:, :c_out]
    shift = s[:, c_out:]
    g2 = params["gn2_gamma"].reshape(1, c_out)
    be2 = params["gn2_beta"].reshape(1, c_out)
    a_film = (g2 * (1.0 + scale)).reshape(B, c_out, 1).astype(jnp.float32)
    b_film = (be2 * (1.0 + scale) + shift).reshape(B, c_out, 1).astype(jnp.float32)
    h2 = pl.pallas_call(
        functools.partial(_conv_gn_film_silu_kernel, num_groups=num_groups, eps=eps),
        out_shape=jax.ShapeDtypeStruct((B, c_out, P1), dtype),
        grid=(B,),
        in_specs=[
            pl.BlockSpec((1, K1, P1), lambda b: (b, 0, 0)),
            pl.BlockSpec((c_out, K1), lambda b: (0, 0)),
            pl.BlockSpec((c_out, 1), lambda b: (0, 0)),
            pl.BlockSpec((1, c_out, 1), lambda b: (b, 0, 0)),
            pl.BlockSpec((1, c_out, 1), lambda b: (b, 0, 0)),
        ],
        out_specs=pl.BlockSpec((1, c_out, P1), lambda b: (b, 0, 0)),
        compiler_params=par1,
    )(xt1, w1, b1, a_film, b_film)
    h2_5 = h2.reshape(B, c_out, D1, H1, W1)

    # ---- 5. conv2 + pooled & narrow_as-cropped skip (fused) ----------------
    xt2, (D2, H2, W2) = _im2col3(h2_5)                    # (B, 27C, P2)
    P2 = D2 * H2 * W2
    K2 = 27 * c_out
    w2 = _conv_weight_mat(params["conv2_w"]).astype(dtype)
    b2 = params["conv2_b"].reshape(c_out, 1).astype(jnp.float32)
    # narrow_as(skip, x): crop the pooled skip by `edge` per spatial dim; expressed directly
    # on the raw input so the skip's AvgPool fuses into this final kernel.
    edge = (Wp - W2) // 2
    xr = x[:, :,
           2 * edge:2 * (edge + D2),
           2 * edge:2 * (edge + H2),
           2 * edge:2 * (edge + W2)]
    skip_cells = _to_pool_cells(xr)                       # (B, 8, C, P2)
    out = pl.pallas_call(
        _conv_skip_kernel,
        out_shape=jax.ShapeDtypeStruct((B, c_out, P2), dtype),
        grid=(B,),
        in_specs=[
            pl.BlockSpec((1, K2, P2), lambda b: (b, 0, 0)),
            pl.BlockSpec((c_out, K2), lambda b: (0, 0)),
            pl.BlockSpec((c_out, 1), lambda b: (0, 0)),
            pl.BlockSpec((1, 8, c_out, P2), lambda b: (b, 0, 0, 0)),
        ],
        out_specs=pl.BlockSpec((1, c_out, P2), lambda b: (b, 0, 0)),
        compiler_params=par1,
    )(xt2, w2, b2, skip_cells)
    return out.reshape(B, c_out, D2, H2, W2)


# ------------------------------ pure-JAX reference ---------------------------


def _reference_forward(x, style, params, *, num_groups=16, eps=1e-6):
    B, C, D, H, W = x.shape
    silu = jax.nn.silu

    def group_norm(v, gamma, beta):
        b, c, d, h, w = v.shape
        cg = c // num_groups
        vg = v.reshape(b, num_groups, cg, d, h, w)
        mu = vg.mean(axis=(2, 3, 4, 5), keepdims=True)
        var = vg.var(axis=(2, 3, 4, 5), keepdims=True)
        vh = ((vg - mu) / jnp.sqrt(var + eps)).reshape(b, c, d, h, w)
        return vh * gamma.reshape(1, c, 1, 1, 1) + beta.reshape(1, c, 1, 1, 1)

    def avgpool2(v):
        b, c, d, h, w = v.shape
        return v.reshape(b, c, d // 2, 2, h // 2, 2, w // 2, 2).mean(axis=(3, 5, 7))

    def conv3d_valid(v, w, bias):
        out = jax.lax.conv_general_dilated(
            v, w, window_strides=(1, 1, 1), padding="VALID",
            dimension_numbers=("NCDHW", "OIDHW", "NCDHW"))
        return out + bias.reshape(1, -1, 1, 1, 1)

    s = silu(style) @ params["embed_w"].T + params["embed_b"]      # (B, 2C)
    scale, bias = s[:, :C], s[:, C:]

    skip = avgpool2(x)                                             # op_skip; self.skip = Identity
    h = group_norm(x, params["gn1_gamma"], params["gn1_beta"])
    h = silu(h)
    h = avgpool2(h)                                                # op_main
    h = conv3d_valid(h, params["conv1_w"], params["conv1_b"])
    h = group_norm(h, params["gn2_gamma"], params["gn2_beta"])
    h = h * (1.0 + scale.reshape(B, C, 1, 1, 1)) + bias.reshape(B, C, 1, 1, 1)
    h = silu(h)
    h = conv3d_valid(h, params["conv2_w"], params["conv2_b"])
    edge = (skip.shape[-1] - h.shape[-1]) // 2
    if edge > 0:
        skip = skip[:, :,
                    edge:skip.shape[2] - edge,
                    edge:skip.shape[3] - edge,
                    edge:skip.shape[4] - edge]
    return h + skip


# ---------------------------------- demo -------------------------------------


if __name__ == "__main__":
    B, C, E, S = 2, 16, 32, 16          # channels must be a multiple of 16 (GroupNorm groups)
    key = jax.random.PRNGKey(0)
    ks = jax.random.split(key, 12)

    x = jax.random.normal(ks[0], (B, C, S, S, S), dtype=jnp.float32)
    style = jax.random.normal(ks[1], (B, E), dtype=jnp.float32)

    params = dict(
        embed_w=jax.random.normal(ks[2], (2 * C, E), jnp.float32) / jnp.sqrt(E),
        embed_b=0.1 * jax.random.normal(ks[3], (2 * C,), jnp.float32),
        gn1_gamma=1.0 + 0.1 * jax.random.normal(ks[4], (C,), jnp.float32),
        gn1_beta=0.1 * jax.random.normal(ks[5], (C,), jnp.float32),
        conv1_w=jax.random.normal(ks[6], (C, C, 3, 3, 3), jnp.float32) / jnp.sqrt(27 * C),
        conv1_b=0.1 * jax.random.normal(ks[7], (C,), jnp.float32),
        gn2_gamma=1.0 + 0.1 * jax.random.normal(ks[8], (C,), jnp.float32),
        gn2_beta=0.1 * jax.random.normal(ks[9], (C,), jnp.float32),
        # zero_module zeroes these at init; non-zero here so the test exercises the main path.
        conv2_w=jax.random.normal(ks[10], (C, C, 3, 3, 3), jnp.float32) / jnp.sqrt(27 * C),
        conv2_b=0.1 * jax.random.normal(ks[11], (C,), jnp.float32),
    )

    out = residual_down_block_forward(x, style, params)
    out = jax.block_until_ready(out)

    ref = _reference_forward(x, style, params)
    assert out.shape == ref.shape == (B, C, 4, 4, 4), (out.shape, ref.shape)
    max_err = float(jnp.max(jnp.abs(out - ref)))
    assert jnp.allclose(out, ref, atol=1e-4, rtol=1e-4), f"max abs err = {max_err}"

    print("KERNEL_OK")
</pallas_src>

<mosaic_0001>
module attributes {stable_mosaic.version = 11 : i64} {
  func.func @_embed_kernel(%arg0: memref<2x32xf32, #tpu.memory_space<vmem>>, %arg1: memref<32x32xf32, #tpu.memory_space<vmem>>, %arg2: memref<1x32xf32, #tpu.memory_space<vmem>>, %arg3: memref<2x32xf32, #tpu.memory_space<vmem>>) attributes {dimension_semantics = [], scalar_prefetch = 0 : i64, scratch_operands = 0 : i64, tpu.core_type = #tpu.core_type<tc>} {
    %c0 = arith.constant 0 : index
    %c0_0 = arith.constant 0 : index
    %0 = vector.load %arg0[%c0, %c0_0] : memref<2x32xf32, #tpu.memory_space<vmem>>, vector<2x32xf32>
    %1 = arith.negf %0 : vector<2x32xf32>
    %2 = math.exp %1 : vector<2x32xf32>
    %cst = arith.constant 1.000000e+00 : f32
    %3 = vector.broadcast %cst : f32 to vector<2x32xf32>
    %4 = arith.addf %3, %2 : vector<2x32xf32>
    %5 = arith.divf %3, %4 : vector<2x32xf32>
    %6 = arith.mulf %0, %5 : vector<2x32xf32>
    %c0_1 = arith.constant 0 : index
    %c0_2 = arith.constant 0 : index
    %7 = vector.load %arg1[%c0_1, %c0_2] : memref<32x32xf32, #tpu.memory_space<vmem>>, vector<32x32xf32>
    %cst_3 = arith.constant dense<0.000000e+00> : vector<2x32xf32>
    %8 = tpu.matmul %6, %7, %cst_3 {dimension_numbers = #tpu.dot_dimension_numbers<[1], [0], [0], [1], [0, 0, 1, 1], [], []>} : vector<2x32xf32>, vector<32x32xf32>, vector<2x32xf32> -> vector<2x32xf32>
    %c0_4 = arith.constant 0 : index
    %c0_5 = arith.constant 0 : index
    %9 = vector.load %arg2[%c0_4, %c0_5] : memref<1x32xf32, #tpu.memory_space<vmem>>, vector<1x32xf32>
    %10 = vector.broadcast %9 : vector<1x32xf32> to vector<2x32xf32>
    %11 = arith.addf %8, %10 : vector<2x32xf32>
    %c0_6 = arith.constant 0 : index
    %c0_7 = arith.constant 0 : index
    %12 = vector.load %arg3[%c0_6, %c0_7] : memref<2x32xf32, #tpu.memory_space<vmem>>, vector<2x32xf32>
    tpu.vector_store %arg3[%c0_6, %c0_7], %11 {strides = array<i32>} : memref<2x32xf32, #tpu.memory_space<vmem>>, vector<2x32xf32>,
    return
  }
}

</mosaic_0001>

<bundles_post_ra>
// kernel: tpu_custom_call.1
= control target key start
LH: loop header
LB: loop body
LE: loop exit
PB: predicated region body
PF: predicated region fallthrough
CT: control target
= control target key end

     0   :  { %8 = vsyncpa [#allocation3], 0  ;;  %s335_s0 = inlined_call_operand.hbm [shape: f32[2,32], index: 0, kind: input, shape index: {}]   ;;  %s336_s1 = inlined_call_operand.hbm [shape: f32[32,32], index: 1, kind: input, shape index: {}]   ;;  %s337_s2 = inlined_call_operand.vmem [shape: f32[1,32], index: 2, kind: input, shape index: {}]   ;;  %s338_s3 = inlined_call_operand.hbm [shape: f32[2,32], index: 3, kind: output, shape index: {}]  }
   0x1   :  { %9 = vsyncpa [#allocation6], 0 }
   0x2   :  { %10 = vsyncpa [#allocation4], 0  ;;  %s261_s12 = smov [#allocation2]   ;;  %s262_s14 = smov [#allocation5]  }
   0x3   :  { %s17_s13 = sshll.u32 %s261_s12, 4  ;;  %s26_s15 = sshll.u32 %s262_s14, 4  ;;  %s18_s13 = int_to_ptr.vmem [resolvable:$true] %s17_s13  ;;  %s289_s15 = int_to_ptr.vmem [resolvable:$true] %s26_s15 }
   0x4   :  { %s189_s18 = scalar_lea.hbm %s335_s0, 32 }
   0x5   :  { %p190_p0 = scmp.ne.s32.totalorder %s335_s0, %s189_s18  ;;  %p193_p1 = scmp.lt.u32.totalorder %s189_s18, %s335_s0 }
   0x7   :  { %p195_p2 = pnand %p193_p1, %p190_p0 }
   0x9   :  { %198 = shalt.err (!%p195_p2)
}
   0xa   :  { %s199_s23 = scalar_lea.vmem %s18_s13, 32  ;;  %p204_p4 = scmp.lt.s32.totalorder %s18_s13, %s18_s13 }
   0xb   :  { %p200_p3 = scmp.ne.s32.totalorder %s18_s13, %s199_s23  ;;  %p205_p5 = scmp.lt.s32.totalorder %s199_s23, %s199_s23 }
   0xd   :  { %p206_p6 = por %p205_p5, %p204_p4 }
   0xf   :  { %p207_p7 = pnand %p206_p6, %p200_p3 }
  0x11   :  { %210 = shalt.err (!%p207_p7)
}
  0x12   :  { %20 = dma.hbm_to_vmem [thread:$0]  %s335_s0, 32, %s18_s13, [#allocation3]  }
  0x13   :  { %s211_s28 = scalar_lea.hbm %s336_s1, 512 }
  0x14   :  { %p212_p8 = scmp.ne.s32.totalorder %s336_s1, %s211_s28  ;;  %p215_p9 = scmp.lt.u32.totalorder %s211_s28, %s336_s1 }
  0x16   :  { %p217_p10 = pnand %p215_p9, %p212_p8 }
  0x18   :  { %220 = shalt.err (!%p217_p10)
}
  0x19   :  { %s221_s6 = scalar_lea.vmem %s289_s15, 512  ;;  %p226_p12 = scmp.lt.s32.totalorder %s289_s15, %s289_s15 }
  0x1a   :  { %p222_p11 = scmp.ne.s32.totalorder %s289_s15, %s221_s6  ;;  %p227_p13 = scmp.lt.s32.totalorder %s221_s6, %s221_s6 }
  0x1c   :  { %p228_p0 = por %p227_p13, %p226_p12 }
  0x1e   :  { %p229_p1 = pnand %p228_p0, %p222_p11 }
  0x20   :  { %232 = shalt.err (!%p229_p1)
}
  0x21   :  { %s263_s0 = smov 128   ;;  %s264_s7 = smov 8  }
  0x22   :  { %32 = dma.hbm_to_vmem [thread:$0]  %s336_s1, 512, %s289_s15, [#allocation6], %s263_s0, %s263_s0, %s264_s7  }
  0x23   :  { %255 = dma.done.wait [#allocation3], 32  }
  0x24   :  { %256 = vsyncadd [#allocation3], 4294967264 }
  0x25   :  { %257 = dma.done.wait [#allocation6], 512  }
  0x26   :  { %258 = vsyncadd [#allocation6], 4294966784  ;;  %v265_v0 = vmov 0.0|0.0   ;;  %vm266_vm0 = vmmov 0   ;;  %v267_v1 = vmov 0.0   ;;  %v49_v2 = vld [vmem:[#allocation5] sm:$0xff] }
  0x27   :  { %171 = vmatprep.subr.bf16.mxu0 %v265_v0  ;;  %168 = vmatprep.mubr.msk.f32.mxu0 %vm266_vm0, %v267_v1  ;;  %v50_v3 = vld [vmem:[#allocation5 + $0x8] sm:$0xff]  ;;  %v51_v4 = vld [vmem:[#allocation5 + $0x10] sm:$0xff]  ;;  %v52_v6 = vld [vmem:[#allocation5 + $0x18] sm:$0xff]  ;;  %vm60_vm1 = vcmask 261120   ;;  %s268_s11 = smov [#allocation7]   ;;  %vm134_vm2 = vcmask 254976  }
  0x28   :  { %v172_v5 = vpack.c.bf16 %v50_v3, %v49_v2  ;;  %v41_v7 = vld [vmem:[#allocation2] sm:$0x3]  ;;  %v175_v9 = vpack.c.bf16 %v52_v6, %v51_v4  ;;  %s142_s12 = sshll.u32 %s268_s11, 4  ;;  %s143_s12 = int_to_ptr.vmem [resolvable:$true] %s142_s12 }
  0x29   :  { %v152_v8 = vmul.f32 -1.442695, %v41_v7  ;;  %v153_v14 = vld [vmem:[%s337_s2] ss:$0 sm:$0xff]  ;;  %s233_s13 = scalar_lea.vmem %s143_s12, 32  ;;  %p238_p3 = scmp.lt.s32.totalorder %s143_s12, %s143_s12 }
  0x2a   :  { %173 = vmatpush3.bf16.msra.mxu0 %v172_v5  ;;  %p234_p2 = scmp.ne.s32.totalorder %s143_s12, %s233_s13  ;;  %p239_p4 = scmp.lt.s32.totalorder %s233_s13, %s233_s13 }
  0x2b   :  { %174 = vmatprep.subr.bf16.mxu0 %v265_v0  ;;  %185 = vpow2.f32 %v152_v8 }
  0x2c   :  { %p240_p5 = por %p239_p4, %p238_p3 }
  0x2e   :  { %176 = vmatpush3.bf16.msra.mxu0 %v175_v9  ;;  %p241_p6 = pnand %p240_p5, %p234_p2 }
  0x35   :  { %v186_v10 = vpop.eup %185 }
  0x36   :  { %v45_v11 = vadd.f32 1.0, %v186_v10 }
  0x38   :  { %187 = vrcp.f32 %v45_v11 }
  0x42   :  { %v188_v12 = vpop.eup %187 }
  0x43   :  { %v48_v13 = vmul.f32 %v188_v12, %v41_v7 }
  0x45   :  { %169 = vmatmul.mubr.msk.f32.vlgmr.msra.gmra.mrb[0].mxu0 %vm60_vm1, %v48_v13 }
 0x118   :  { %v130_v15 = vpop.f32.mrb[0].mxu0 }
 0x119   :  { %v131_v16 = vadd.f32 %v153_v14, %v130_v15  ;;  %v170_v17 = vpop.f32.mrb[1].mxu0 }
 0x11b   :  { %135 = vst.msk [vmem:[#allocation7] sm:$0x3] %vm134_vm2, %v131_v16 }
 0x11c   :  { %244 = shalt.err (!%p241_p6)
}
 0x11d   :  { %s245_s16 = scalar_lea.hbm %s338_s3, 32 }
 0x11e   :  { %p246_p7 = scmp.ne.s32.totalorder %s338_s3, %s245_s16  ;;  %p249_p8 = scmp.lt.u32.totalorder %s245_s16, %s338_s3 }
 0x120   :  { %p251_p9 = pnand %p249_p8, %p246_p7 }
 0x122   :  { %254 = shalt.err (!%p251_p9)
}
 0x123   :  { %145 = dma.vmem_to_hbm [thread:$0]  %s143_s12, 32, %s338_s3, [#allocation4]  }
 0x124   :  { %259 = dma.done.wait [#allocation4], 32  }
 0x125   :  { %260 = vsyncadd [#allocation4], 4294967264 }
 0x126   :  { %149 = vsyncpa [#allocation3], 1 }
 0x127   :  { %150 = vsyncpa [#allocation6], 1 }
 0x128   :  { %151 = vsyncpa [#allocation4], 1 }

</bundles_post_ra>
